<compile_context>
chip_gen: v7x
topology: tpu7x:2x2x1
jax: 0.10.0
libtpu: 0.0.40
codegen_flags: <defaults>
</compile_context>

<pallas_src>
import functools

import jax
import jax.numpy as jnp
from jax.experimental import pallas as pl
from jax.experimental.pallas import tpu as pltpu

# Problem sizes (small MLP consistent with the module).
STATE_DIM = 16
HIDDEN_IN = 32
HIDDEN_OUT = 32
ACTION_DIM = 8

BATCH = 1024      # rollout-sized example batch
TILE_B = 512      # batch tile per grid step (2 steps for the demo batch)


def _policy_kernel(x_ref, w1_ref, b1_ref, w2_ref, b2_ref, w3_ref, b3_ref,
                   g_ref, logp_ref, act_ref):
    # Batch-in-lanes: transpose the (TB, S) state tile to (S, TB) so all
    # activations / reductions run on full 128-lane vregs.  Cast to bf16 on the
    # VPU for the MXU matmuls; accumulation and elementwise math stay f32.
    xt = jnp.transpose(x_ref[...]).astype(jnp.bfloat16)                # (S, TB)

    # Layer 1: Linear + ReLU
    h1 = jnp.dot(w1_ref[...], xt, preferred_element_type=jnp.float32) + b1_ref[...]
    h1 = jnp.maximum(h1, 0.0)                                          # (H1, TB) f32

    # Layer 2: Linear + ReLU
    h2 = jnp.dot(w2_ref[...], h1.astype(jnp.bfloat16),
                 preferred_element_type=jnp.float32) + b2_ref[...]
    h2 = jnp.maximum(h2, 0.0)                                          # (H2, TB) f32

    # Layer 3: Linear -> logits
    logits = jnp.dot(w3_ref[...], h2.astype(jnp.bfloat16),
                     preferred_element_type=jnp.float32) + b3_ref[...]  # (A, TB) f32

    # Numerically stable log-softmax along the action (sublane) axis.
    m = jnp.max(logits, axis=0, keepdims=True)
    lse = m + jnp.log(jnp.sum(jnp.exp(logits - m), axis=0, keepdims=True))
    logp = logits - lse                                                 # (A, TB)

    # Gumbel-max categorical sample (noise streamed in, lane-dense).
    y = logp + g_ref[...]                                               # (A, TB)
    best = jnp.max(y, axis=0, keepdims=True)
    idx = jax.lax.broadcasted_iota(jnp.int32, y.shape, 0)
    action = jnp.min(jnp.where(y == best, idx, ACTION_DIM),
                     axis=0, keepdims=True)                             # (1, TB) i32
    sel_logp = jnp.sum(jnp.where(idx == action, logp, 0.0),
                       axis=0, keepdims=True)                           # (1, TB) f32

    logp_ref[...] = sel_logp    # lane-dense (1, TB) stores
    act_ref[...] = action


@functools.partial(jax.jit, static_argnames=("tile_b",))
def network_forward(state, kernel_params, key, *, tile_b=TILE_B):
    """Mirrors Network.forward: returns (log_prob(action), action)."""
    w1t, b1, w2t, b2, w3t, b3 = kernel_params
    B = state.shape[0]
    b_pad = ((B + tile_b - 1) // tile_b) * tile_b

    x = state                                   # f32; cast to bf16 inside the kernel
    if b_pad != B:
        x = jnp.pad(x, ((0, b_pad - B), (0, 0)))

    # Gumbel(0,1) noise for Categorical sampling (one tiny XLA op, overlaps the call).
    gumbel = jax.random.gumbel(key, (ACTION_DIM, b_pad), jnp.float32)

    grid = (b_pad // tile_b,)
    mac = STATE_DIM * HIDDEN_IN + HIDDEN_IN * HIDDEN_OUT + HIDDEN_OUT * ACTION_DIM
    cost = pl.CostEstimate(
        flops=2 * b_pad * mac,
        transcendentals=b_pad * (ACTION_DIM + 1),
        bytes_accessed=(b_pad * STATE_DIM * 4          # state
                        + b_pad * ACTION_DIM * 4       # gumbel
                        + b_pad * 8                    # outputs
                        + 2 * mac                      # bf16 weights
                        + 4 * (HIDDEN_IN + HIDDEN_OUT + ACTION_DIM)),  # biases
    )

    logp, action = pl.pallas_call(
        _policy_kernel,
        out_shape=(
            jax.ShapeDtypeStruct((1, b_pad), jnp.float32),
            jax.ShapeDtypeStruct((1, b_pad), jnp.int32),
        ),
        grid=grid,
        in_specs=[
            # Batch-tiled state stream (auto double-buffered).
            pl.BlockSpec((tile_b, STATE_DIM), lambda i: (i, 0)),
            # Weights / biases: full-array blocks, grid-invariant -> VMEM resident.
            pl.BlockSpec((HIDDEN_IN, STATE_DIM), lambda i: (0, 0)),
            pl.BlockSpec((HIDDEN_IN, 1), lambda i: (0, 0)),
            pl.BlockSpec((HIDDEN_OUT, HIDDEN_IN), lambda i: (0, 0)),
            pl.BlockSpec((HIDDEN_OUT, 1), lambda i: (0, 0)),
            pl.BlockSpec((ACTION_DIM, HIDDEN_OUT), lambda i: (0, 0)),
            pl.BlockSpec((ACTION_DIM, 1), lambda i: (0, 0)),
            # Gumbel noise tile, lane-dense along the batch axis.
            pl.BlockSpec((ACTION_DIM, tile_b), lambda i: (0, i)),
        ],
        out_specs=(
            pl.BlockSpec((1, tile_b), lambda i: (0, i)),
            pl.BlockSpec((1, tile_b), lambda i: (0, i)),
        ),
        compiler_params=pltpu.CompilerParams(
            dimension_semantics=("parallel",),
        ),
        cost_estimate=cost,
    )(x, w1t, b1, w2t, b2, w3t, b3, gumbel)

    return logp[0, :B], action[0, :B]


def init_params(key):
    """Deterministic f32 init matching nn.Linear's U(-1/sqrt(fan_in), 1/sqrt(fan_in))."""
    ks = jax.random.split(key, 6)

    def linear(kw, kb, fan_in, fan_out):
        bound = 1.0 / jnp.sqrt(float(fan_in))
        w = jax.random.uniform(kw, (fan_in, fan_out), jnp.float32, -bound, bound)
        b = jax.random.uniform(kb, (fan_out,), jnp.float32, -bound, bound)
        return w, b

    w1, b1 = linear(ks[0], ks[1], STATE_DIM, HIDDEN_IN)
    w2, b2 = linear(ks[2], ks[3], HIDDEN_IN, HIDDEN_OUT)
    w3, b3 = linear(ks[4], ks[5], HIDDEN_OUT, ACTION_DIM)
    return (w1, b1, w2, b2, w3, b3)


def pack_params(params):
    """One-time packing for the kernel: transposed bf16 weights, (out, 1) f32 biases."""
    w1, b1, w2, b2, w3, b3 = params
    return (w1.T.astype(jnp.bfloat16), b1.reshape(-1, 1).astype(jnp.float32),
            w2.T.astype(jnp.bfloat16), b2.reshape(-1, 1).astype(jnp.float32),
            w3.T.astype(jnp.bfloat16), b3.reshape(-1, 1).astype(jnp.float32))


def _reference_log_probs(state, params):
    """Pure-JAX f32 reference of the MLP + log-softmax (consistency check)."""
    w1, b1, w2, b2, w3, b3 = params
    h1 = jnp.maximum(state @ w1 + b1, 0.0)
    h2 = jnp.maximum(h1 @ w2 + b2, 0.0)
    logits = h2 @ w3 + b3
    return jax.nn.log_softmax(logits, axis=-1)


if __name__ == "__main__":
    root = jax.random.PRNGKey(0)
    k_params, k_state, k_sample = jax.random.split(root, 3)

    params = init_params(k_params)
    kernel_params = pack_params(params)   # packed once, outside the per-call jit
    state = jax.random.normal(k_state, (BATCH, STATE_DIM), dtype=jnp.float32)

    log_prob, action = network_forward(state, kernel_params, k_sample)
    jax.block_until_ready((log_prob, action))

    # Sanity: shapes, valid actions, log-probs <= 0.
    assert log_prob.shape == (BATCH,)
    assert action.shape == (BATCH,)
    assert bool(jnp.all(log_prob <= 1e-5))
    assert bool(jnp.all((action >= 0) & (action < ACTION_DIM)))

    # Consistency: selected log-prob matches the f32 reference log-softmax at the
    # sampled action (bf16 matmul operands -> loose tolerance).
    ref_logp = _reference_log_probs(state, params)
    ref_sel = jnp.take_along_axis(ref_logp, action[:, None].astype(jnp.int32), axis=-1)[:, 0]
    assert bool(jnp.max(jnp.abs(log_prob - ref_sel)) < 5e-2)

    print("KERNEL_OK")
</pallas_src>

<mosaic_0001>
module attributes {stable_mosaic.version = 11 : i64} {
  func.func @_policy_kernel(%arg0: i32, %arg1: memref<512x16xf32, #tpu.memory_space<vmem>>, %arg2: memref<32x16xbf16, #tpu.memory_space<vmem>>, %arg3: memref<32x1xf32, #tpu.memory_space<vmem>>, %arg4: memref<32x32xbf16, #tpu.memory_space<vmem>>, %arg5: memref<32x1xf32, #tpu.memory_space<vmem>>, %arg6: memref<8x32xbf16, #tpu.memory_space<vmem>>, %arg7: memref<8x1xf32, #tpu.memory_space<vmem>>, %arg8: memref<8x512xf32, #tpu.memory_space<vmem>>, %arg9: memref<1x512xf32, #tpu.memory_space<vmem>>, %arg10: memref<1x512xi32, #tpu.memory_space<vmem>>) attributes {dimension_semantics = [#tpu.dimension_semantics<parallel>], iteration_bounds = array<i64: 2>, scalar_prefetch = 0 : i64, scratch_operands = 0 : i64, tpu.core_type = #tpu.core_type<tc>, window_params = [{transform_indices = @transform_0, window_bounds = array<i64: 512, 16>}, {pipeline_mode = #tpu.pipeline_mode<synchronous>, transform_indices = @transform_1, window_bounds = array<i64: 32, 16>}, {pipeline_mode = #tpu.pipeline_mode<synchronous>, transform_indices = @transform_2, window_bounds = array<i64: 32, 1>}, {pipeline_mode = #tpu.pipeline_mode<synchronous>, transform_indices = @transform_3, window_bounds = array<i64: 32, 32>}, {pipeline_mode = #tpu.pipeline_mode<synchronous>, transform_indices = @transform_4, window_bounds = array<i64: 32, 1>}, {pipeline_mode = #tpu.pipeline_mode<synchronous>, transform_indices = @transform_5, window_bounds = array<i64: 8, 32>}, {pipeline_mode = #tpu.pipeline_mode<synchronous>, transform_indices = @transform_6, window_bounds = array<i64: 8, 1>}, {transform_indices = @transform_7, window_bounds = array<i64: 8, 512>}, {transform_indices = @transform_8, window_bounds = array<i64: 1, 512>}, {transform_indices = @transform_9, window_bounds = array<i64: 1, 512>}]} {
    %c0 = arith.constant 0 : index
    %c0_0 = arith.constant 0 : index
    %0 = vector.load %arg1[%c0, %c0_0] : memref<512x16xf32, #tpu.memory_space<vmem>>, vector<512x16xf32>
    %1 = tpu.transpose %0, [1, 0] : vector<512x16xf32> -> vector<16x512xf32>
    %2 = arith.truncf %1 : vector<16x512xf32> to vector<16x512xbf16>
    %c0_1 = arith.constant 0 : index
    %c0_2 = arith.constant 0 : index
    %3 = vector.load %arg2[%c0_1, %c0_2] : memref<32x16xbf16, #tpu.memory_space<vmem>>, vector<32x16xbf16>
    %cst = arith.constant dense<0.000000e+00> : vector<32x512xf32>
    %4 = tpu.matmul %3, %2, %cst {dimension_numbers = #tpu.dot_dimension_numbers<[1], [0], [0], [1], [0, 0, 1, 1], [], []>} : vector<32x16xbf16>, vector<16x512xbf16>, vector<32x512xf32> -> vector<32x512xf32>
    %c0_3 = arith.constant 0 : index
    %c0_4 = arith.constant 0 : index
    %5 = vector.load %arg3[%c0_3, %c0_4] : memref<32x1xf32, #tpu.memory_space<vmem>>, vector<32x1xf32>
    %6 = vector.broadcast %5 : vector<32x1xf32> to vector<32x512xf32>
    %7 = arith.addf %4, %6 : vector<32x512xf32>
    %cst_5 = arith.constant 0.000000e+00 : f32
    %8 = vector.broadcast %cst_5 : f32 to vector<32x512xf32>
    %9 = arith.maximumf %7, %8 : vector<32x512xf32>
    %c0_6 = arith.constant 0 : index
    %c0_7 = arith.constant 0 : index
    %10 = vector.load %arg4[%c0_6, %c0_7] : memref<32x32xbf16, #tpu.memory_space<vmem>>, vector<32x32xbf16>
    %11 = arith.truncf %9 : vector<32x512xf32> to vector<32x512xbf16>
    %cst_8 = arith.constant dense<0.000000e+00> : vector<32x512xf32>
    %12 = tpu.matmul %10, %11, %cst_8 {dimension_numbers = #tpu.dot_dimension_numbers<[1], [0], [0], [1], [0, 0, 1, 1], [], []>} : vector<32x32xbf16>, vector<32x512xbf16>, vector<32x512xf32> -> vector<32x512xf32>
    %c0_9 = arith.constant 0 : index
    %c0_10 = arith.constant 0 : index
    %13 = vector.load %arg5[%c0_9, %c0_10] : memref<32x1xf32, #tpu.memory_space<vmem>>, vector<32x1xf32>
    %14 = vector.broadcast %13 : vector<32x1xf32> to vector<32x512xf32>
    %15 = arith.addf %12, %14 : vector<32x512xf32>
    %cst_11 = arith.constant 0.000000e+00 : f32
    %16 = vector.broadcast %cst_11 : f32 to vector<32x512xf32>
    %17 = arith.maximumf %15, %16 : vector<32x512xf32>
    %c0_12 = arith.constant 0 : index
    %c0_13 = arith.constant 0 : index
    %18 = vector.load %arg6[%c0_12, %c0_13] : memref<8x32xbf16, #tpu.memory_space<vmem>>, vector<8x32xbf16>
    %19 = arith.truncf %17 : vector<32x512xf32> to vector<32x512xbf16>
    %cst_14 = arith.constant dense<0.000000e+00> : vector<8x512xf32>
    %20 = tpu.matmul %18, %19, %cst_14 {dimension_numbers = #tpu.dot_dimension_numbers<[1], [0], [0], [1], [0, 0, 1, 1], [], []>} : vector<8x32xbf16>, vector<32x512xbf16>, vector<8x512xf32> -> vector<8x512xf32>
    %c0_15 = arith.constant 0 : index
    %c0_16 = arith.constant 0 : index
    %21 = vector.load %arg7[%c0_15, %c0_16] : memref<8x1xf32, #tpu.memory_space<vmem>>, vector<8x1xf32>
    %22 = vector.broadcast %21 : vector<8x1xf32> to vector<8x512xf32>
    %23 = arith.addf %20, %22 : vector<8x512xf32>
    %cst_17 = arith.constant dense<0xFF800000> : vector<512xf32>
    %24 = vector.multi_reduction <maximumf>, %23, %cst_17 [0] : vector<8x512xf32> to vector<512xf32>
    %25 = vector.shape_cast %24 : vector<512xf32> to vector<1x512xf32>
    %26 = vector.broadcast %25 : vector<1x512xf32> to vector<8x512xf32>
    %27 = arith.subf %23, %26 : vector<8x512xf32>
    %28 = math.exp %27 : vector<8x512xf32>
    %cst_18 = arith.constant dense<0.000000e+00> : vector<512xf32>
    %29 = vector.multi_reduction <add>, %28, %cst_18 [0] : vector<8x512xf32> to vector<512xf32>
    %30 = vector.shape_cast %29 : vector<512xf32> to vector<1x512xf32>
    %31 = math.log %30 : vector<1x512xf32>
    %32 = arith.addf %25, %31 : vector<1x512xf32>
    %33 = vector.broadcast %32 : vector<1x512xf32> to vector<8x512xf32>
    %34 = arith.subf %23, %33 : vector<8x512xf32>
    %c0_19 = arith.constant 0 : index
    %c0_20 = arith.constant 0 : index
    %35 = vector.load %arg8[%c0_19, %c0_20] : memref<8x512xf32, #tpu.memory_space<vmem>>, vector<8x512xf32>
    %36 = arith.addf %34, %35 : vector<8x512xf32>
    %cst_21 = arith.constant dense<0xFF800000> : vector<512xf32>
    %37 = vector.multi_reduction <maximumf>, %36, %cst_21 [0] : vector<8x512xf32> to vector<512xf32>
    %38 = vector.shape_cast %37 : vector<512xf32> to vector<1x512xf32>
    %39 = tpu.iota {dimensions = array<i32: 0>} : vector<8x512xi32>
    %40 = vector.broadcast %38 : vector<1x512xf32> to vector<8x512xf32>
    %41 = arith.cmpf oeq, %36, %40 : vector<8x512xf32>
    %c8_i32 = arith.constant 8 : i32
    %42 = vector.broadcast %c8_i32 : i32 to vector<8x512xi32>
    %43 = arith.select %41, %39, %42 : vector<8x512xi1>, vector<8x512xi32>
    %cst_22 = arith.constant dense<2147483647> : vector<512xi32>
    %44 = vector.multi_reduction <minsi>, %43, %cst_22 [0] : vector<8x512xi32> to vector<512xi32>
    %45 = vector.shape_cast %44 : vector<512xi32> to vector<1x512xi32>
    %46 = vector.broadcast %45 : vector<1x512xi32> to vector<8x512xi32>
    %47 = arith.cmpi eq, %39, %46 : vector<8x512xi32>
    %cst_23 = arith.constant 0.000000e+00 : f32
    %48 = vector.broadcast %cst_23 : f32 to vector<8x512xf32>
    %49 = arith.select %47, %34, %48 : vector<8x512xi1>, vector<8x512xf32>
    %cst_24 = arith.constant dense<0.000000e+00> : vector<512xf32>
    %50 = vector.multi_reduction <add>, %49, %cst_24 [0] : vector<8x512xf32> to vector<512xf32>
    %51 = vector.shape_cast %50 : vector<512xf32> to vector<1x512xf32>
    %c0_25 = arith.constant 0 : index
    %c0_26 = arith.constant 0 : index
    %52 = vector.load %arg9[%c0_25, %c0_26] : memref<1x512xf32, #tpu.memory_space<vmem>>, vector<1x512xf32>
    tpu.vector_store %arg9[%c0_25, %c0_26], %51 {strides = array<i32>} : memref<1x512xf32, #tpu.memory_space<vmem>>, vector<1x512xf32>,
    %c0_27 = arith.constant 0 : index
    %c0_28 = arith.constant 0 : index
    %53 = vector.load %arg10[%c0_27, %c0_28] : memref<1x512xi32, #tpu.memory_space<vmem>>, vector<1x512xi32>
    tpu.vector_store %arg10[%c0_27, %c0_28], %45 {strides = array<i32>} : memref<1x512xi32, #tpu.memory_space<vmem>>, vector<1x512xi32>,
    return
  }
  func.func @transform_0(%arg0: i32) -> (i32, i32) {
    %c0_i32 = arith.constant 0 : i32
    %c0_i32_0 = arith.constant 0 : i32
    return %arg0, %c0_i32 : i32, i32
  }
  func.func @transform_1(%arg0: i32) -> (i32, i32) {
    %c0_i32 = arith.constant 0 : i32
    %c0_i32_0 = arith.constant 0 : i32
    %c0_i32_1 = arith.constant 0 : i32
    return %c0_i32, %c0_i32_0 : i32, i32
  }
  func.func @transform_2(%arg0: i32) -> (i32, i32) {
    %c0_i32 = arith.constant 0 : i32
    %c0_i32_0 = arith.constant 0 : i32
    %c0_i32_1 = arith.constant 0 : i32
    return %c0_i32, %c0_i32_0 : i32, i32
  }
  func.func @transform_3(%arg0: i32) -> (i32, i32) {
    %c0_i32 = arith.constant 0 : i32
    %c0_i32_0 = arith.constant 0 : i32
    %c0_i32_1 = arith.constant 0 : i32
    return %c0_i32, %c0_i32_0 : i32, i32
  }
  func.func @transform_4(%arg0: i32) -> (i32, i32) {
    %c0_i32 = arith.constant 0 : i32
    %c0_i32_0 = arith.constant 0 : i32
    %c0_i32_1 = arith.constant 0 : i32
    return %c0_i32, %c0_i32_0 : i32, i32
  }
  func.func @transform_5(%arg0: i32) -> (i32, i32) {
    %c0_i32 = arith.constant 0 : i32
    %c0_i32_0 = arith.constant 0 : i32
    %c0_i32_1 = arith.constant 0 : i32
    return %c0_i32, %c0_i32_0 : i32, i32
  }
  func.func @transform_6(%arg0: i32) -> (i32, i32) {
    %c0_i32 = arith.constant 0 : i32
    %c0_i32_0 = arith.constant 0 : i32
    %c0_i32_1 = arith.constant 0 : i32
    return %c0_i32, %c0_i32_0 : i32, i32
  }
  func.func @transform_7(%arg0: i32) -> (i32, i32) {
    %c0_i32 = arith.constant 0 : i32
    %c0_i32_0 = arith.constant 0 : i32
    return %c0_i32, %arg0 : i32, i32
  }
  func.func @transform_8(%arg0: i32) -> (i32, i32) {
    %c0_i32 = arith.constant 0 : i32
    %c0_i32_0 = arith.constant 0 : i32
    return %c0_i32, %arg0 : i32, i32
  }
  func.func @transform_9(%arg0: i32) -> (i32, i32) {
    %c0_i32 = arith.constant 0 : i32
    %c0_i32_0 = arith.constant 0 : i32
    return %c0_i32, %arg0 : i32, i32
  }
}

</mosaic_0001>

<bundles_post_ra>
// kernel: network_forward.1
= control target key start
LH: loop header
LB: loop body
LE: loop exit
PB: predicated region body
PF: predicated region fallthrough
CT: control target
= control target key end

     0   :  { %15 = vsyncpa [#allocation3], 0  ;;  %s2073_s0 = inlined_call_operand.vmem [shape: f32[1024,16], index: 0, kind: input, shape index: {}]   ;;  %s2074_s1 = inlined_call_operand.vmem [shape: bf16[32,16], index: 1, kind: input, shape index: {}]   ;;  %s2075_s2 = inlined_call_operand.vmem [shape: f32[32,1], index: 2, kind: input, shape index: {}]   ;;  %s2076_s3 = inlined_call_operand.vmem [shape: bf16[32,32], index: 3, kind: input, shape index: {}]   ;;  %s2077_s4 = inlined_call_operand.vmem [shape: f32[32,1], index: 4, kind: input, shape index: {}]   ;;  %s2078_s5 = inlined_call_operand.vmem [shape: bf16[8,32], index: 5, kind: input, shape index: {}]   ;;  %s2079_s6 = inlined_call_operand.vmem [shape: f32[8,1], index: 6, kind: input, shape index: {}]   ;;  %s2080_s7 = inlined_call_operand.vmem [shape: f32[8,1024], index: 7, kind: input, shape index: {}]   ;;  %s2081_s8 = inlined_call_operand.hbm [shape: f32[1,1024], index: 8, kind: output, shape index: {0}]   ;;  %s2082_s9 = inlined_call_operand.hbm [shape: s32[1,1024], index: 9, kind: output, shape index: {1}]  }
   0x1   :  { %17 = vsyncpa [#allocation3 + $0x1], 0 }
   0x2   :  { %18 = vsyncpa [#allocation5], 0 }
   0x3   :  { %20 = vsyncpa [#allocation5 + $0x1], 0  ;;  %s1725_s30 = smov 0   ;;  %s1727_s10 = smov 0  }
   0x4   :  { %s1729_s11 = smov 0   ;;  %s1731_s12 = smov 0  }
   0x5 LB: > { %s1746_s13 = sadd.s32 4294967295, %s1669_s12   ;;  %s1389_s14 = sadd.s32 4294967294, %s1669_s12   ;;  %s1669_s12 = sphi %s1731_s12, %s2092_s12   ;;  %s1665_s11 = sphi %s1729_s11, %s2091_s11   ;;  %s1661_s10 = sphi %s1727_s10, %s2090_s10   ;;  %s1657_s30 = sphi %s1725_s30, %s2089_s30  }
   0x6   : > { %s1750_s15 = sadd.s32 1, %s1669_s12   ;;  %s211_s16 = sadd.s32 1, %s1665_s11 }
   0x7   : > { %s208_s17 = ssub.s32 %s1669_s12, %s1750_s15  ;;  %p221_p0 = scmp.ne.s32.totalorder %s1665_s11, %s1661_s10 }
   0x8   : > { %p209_p1 = scmp.eq.s32.totalorder %s208_s17, 0  ;;  %p222_p2 = scmp.eq.s32.totalorder %s1746_s13, 1 }
   0x9   : > { %p227_p3 = scmp.ne.s32.totalorder %s1661_s10, %s1657_s30  ;;  %p228_p4 = scmp.eq.s32.totalorder %s1389_s14, 1 }
   0xa   : > { %s1761_s18 = scalar_select %p209_p1, %s1665_s11, %s211_s16  }
   0xb   : > { %p1763_p5 = por %p222_p2, %p221_p0  ;;  %p1767_p6 = por %p228_p4, %p227_p3 }
   0xc   : > { %p1392_p7 = scmp.ge.s32.totalorder %s1669_s12, 1  ;;  %p308_p8 = scmp.lt.s32.totalorder %s1669_s12, 3 }
   0xe   : > { %p309_p9 = pnand %p1392_p7, %p308_p8 }
   0xf   : > { %s1774_s21 = sshll.u32 (!%p309_p9), %s1746_s13, 6  ;;  %v1671_v28 = vmov (!%p309_p9), 0   ;;  %vm603_vm0 = vcmask (!%p309_p9), 130048   ;;  %vm778_vm1 = vcmask (!%p309_p9), 261120   ;;  %s1673_s24 = smov (!%p309_p9), [#allocation4]  }
  0x10   : > { %312 = sbr.rel (%p309_p9) target bundleno = 989 (0x3dd), region = 52  ;;  %p355_p10 = scmp.lt.s32.totalorder (!%p309_p9), %s1774_s21, 127  ;;  %642 = vmatprep.mubr.bf16.mxu0 (!%p309_p9), %v1671_v28  ;;  %695 = vmatprep.mubr.bf16.mxu1 (!%p309_p9), %v1671_v28 }
  0x11   : > { %s1991_s17 = scalar_lea.hbm (!%p309_p9), %s2082_s9, %s1774_s21  ;;  %s1579_s25 = sshll.u32 (!%p309_p9), %s1673_s24, 4  ;;  %s1580_s25 = int_to_ptr.vmem [resolvable:$false] %s1579_s25 }
  0x17   : > { %s356_s22 = scalar_select %p355_p10, %s1774_s21, 127 }
  0x19   : > { %s1396_s23 = sshll.u32 %s356_s22, 3  ;;  %s1397_s22 = sshll.u32 %s1746_s13, 2 }
  0x1a   : > { %s1781_s26 = scalar_lea.vmem %s2073_s0, %s1396_s23  ;;  %p361_p11 = scmp.lt.s32.totalorder %s1397_s22, 7 }
  0x1b   : > { %v385_v0 = vld [vmem:[%s1781_s26 + $0x80] sm:$0xff]  ;;  %v386_v5 = vld [vmem:[%s1781_s26 + $0x88] sm:$0xff]  ;;  %v387_v12 = vld [vmem:[%s1781_s26 + $0x90] sm:$0xff] }
  0x1c   : > { %v417_v1 = vld [vmem:[%s1781_s26 + $0x180] sm:$0xff]  ;;  %v418_v6 = vld [vmem:[%s1781_s26 + $0x188] sm:$0xff]  ;;  %v419_v13 = vld [vmem:[%s1781_s26 + $0x190] sm:$0xff]  ;;  %s2094_s22 = smov (!%p361_p11, %s1397_s22), 7 }
  0x1d   : > { %v369_v2 = vld [vmem:[%s1781_s26] sm:$0xff]  ;;  %v1469_v3 = vpack.i.bf16 %v417_v1, %v385_v0  ;;  %v370_v8 = vld [vmem:[%s1781_s26 + $0x8] sm:$0xff]  ;;  %v1471_v10 = vpack.i.bf16 %v418_v6, %v386_v5  ;;  %v371_v14 = vld [vmem:[%s1781_s26 + $0x10] sm:$0xff]  ;;  %v1473_v16 = vpack.i.bf16 %v419_v13, %v387_v12  ;;  %s1398_s23 = sshll.u32 %s2094_s22, 3 }
  0x1e   : > { %v401_v4 = vld [vmem:[%s1781_s26 + $0x100] sm:$0xff]  ;;  %v402_v9 = vld [vmem:[%s1781_s26 + $0x108] sm:$0xff]  ;;  %v403_v15 = vld [vmem:[%s1781_s26 + $0x110] sm:$0xff]  ;;  %s364_s13 = scalar_lea.vmem %s2080_s7, %s1398_s23 }
  0x1f   : > { %v1511_v7 = vpack.i.bf16 %v401_v4, %v369_v2  ;;  %1470 = vxpose.xlu0.b32.start [1/16] (narrow) %v1469_v3, 16  ;;  %v1513_v11 = vpack.i.bf16 %v402_v9, %v370_v8  ;;  %v1515_v17 = vpack.i.bf16 %v403_v15, %v371_v14  ;;  %v388_v18 = vld [vmem:[%s1781_s26 + $0x98] sm:$0xff]  ;;  %v389_v24 = vld [vmem:[%s1781_s26 + $0xa0] sm:$0xff]  ;;  %v390_v31 = vld [vmem:[%s1781_s26 + $0xa8] sm:$0xff] }
  0x20   : > { %v420_v19 = vld [vmem:[%s1781_s26 + $0x198] sm:$0xff]  ;;  %v421_v25 = vld [vmem:[%s1781_s26 + $0x1a0] sm:$0xff]  ;;  %v422_v32 = vld [vmem:[%s1781_s26 + $0x1a8] sm:$0xff] }
  0x21   : > { %1512 = vxpose.xlu1.b32.start [1/16] (narrow) %v1511_v7, 16  ;;  %v372_v20 = vld [vmem:[%s1781_s26 + $0x18] sm:$0xff]  ;;  %v1475_v22 = vpack.i.bf16 %v420_v19, %v388_v18  ;;  %v373_v26 = vld [vmem:[%s1781_s26 + $0x20] sm:$0xff]  ;;  %v1477_v29 = vpack.i.bf16 %v421_v25, %v389_v24  ;;  %v374_v33 = vld [vmem:[%s1781_s26 + $0x28] sm:$0xff]  ;;  %v1479_v35 = vpack.i.bf16 %v422_v32, %v390_v31 }
  0x22   : > { %v404_v21 = vld [vmem:[%s1781_s26 + $0x118] sm:$0xff]  ;;  %v405_v27 = vld [vmem:[%s1781_s26 + $0x120] sm:$0xff]  ;;  %v406_v34 = vld [vmem:[%s1781_s26 + $0x128] sm:$0xff] }
  0x23   : > { %1472 = vxpose.xlu0.b32.cont [2/16] (narrow) %v1471_v10, 16  ;;  %v1517_v23 = vpack.i.bf16 %v404_v21, %v372_v20  ;;  %v1519_v30 = vpack.i.bf16 %v405_v27, %v373_v26  ;;  %v1521_v36 = vpack.i.bf16 %v406_v34, %v374_v33  ;;  %v391_v37 = vld [vmem:[%s1781_s26 + $0xb0] sm:$0xff]  ;;  %v392_v43 = vld [vmem:[%s1781_s26 + $0xb8] sm:$0xff]  ;;  %v393_v49 = vld [vmem:[%s1781_s26 + $0xc0] sm:$0xff] }
  0x24   : > { %v423_v38 = vld [vmem:[%s1781_s26 + $0x1b0] sm:$0xff]  ;;  %v424_v44 = vld [vmem:[%s1781_s26 + $0x1b8] sm:$0xff]  ;;  %v425_v50 = vld [vmem:[%s1781_s26 + $0x1c0] sm:$0xff] }
  0x25   : > { %1514 = vxpose.xlu1.b32.cont [2/16] (narrow) %v1513_v11, 16  ;;  %v375_v39 = vld [vmem:[%s1781_s26 + $0x30] sm:$0xff]  ;;  %v1481_v41 = vpack.i.bf16 %v423_v38, %v391_v37  ;;  %v376_v45 = vld [vmem:[%s1781_s26 + $0x38] sm:$0xff]  ;;  %v1483_v47 = vpack.i.bf16 %v424_v44, %v392_v43  ;;  %v377_v51 = vld [vmem:[%s1781_s26 + $0x40] sm:$0xff]  ;;  %v1485_v53 = vpack.i.bf16 %v425_v50, %v393_v49 }
  0x26   : > { %v407_v40 = vld [vmem:[%s1781_s26 + $0x130] sm:$0xff]  ;;  %v408_v46 = vld [vmem:[%s1781_s26 + $0x138] sm:$0xff]  ;;  %v409_v52 = vld [vmem:[%s1781_s26 + $0x140] sm:$0xff] }
  0x27   : > { %1474 = vxpose.xlu0.b32.cont [3/16] (narrow) %v1473_v16, 16  ;;  %v1523_v42 = vpack.i.bf16 %v407_v40, %v375_v39  ;;  %v1525_v48 = vpack.i.bf16 %v408_v46, %v376_v45  ;;  %v1527_v54 = vpack.i.bf16 %v409_v52, %v377_v51  ;;  %v394_v55 = vld [vmem:[%s1781_s26 + $0xc8] sm:$0xff]  ;;  %v395_v61 = vld [vmem:[%s1781_s26 + $0xd0] sm:$0xff]  ;;  %v396_v3 = vld [vmem:[%s1781_s26 + $0xd8] sm:$0xff] }
  0x28   : > { %v426_v56 = vld [vmem:[%s1781_s26 + $0x1c8] sm:$0xff]  ;;  %v427_v62 = vld [vmem:[%s1781_s26 + $0x1d0] sm:$0xff]  ;;  %v428_v4 = vld [vmem:[%s1781_s26 + $0x1d8] sm:$0xff] }
  0x29   : > { %1516 = vxpose.xlu1.b32.cont [3/16] (narrow) %v1515_v17, 16  ;;  %v378_v57 = vld [vmem:[%s1781_s26 + $0x48] sm:$0xff]  ;;  %v1487_v59 = vpack.i.bf16 %v426_v56, %v394_v55  ;;  %v379_v63 = vld [vmem:[%s1781_s26 + $0x50] sm:$0xff]  ;;  %v1489_v1 = vpack.i.bf16 %v427_v62, %v395_v61  ;;  %v380_v5 = vld [vmem:[%s1781_s26 + $0x58] sm:$0xff]  ;;  %v1491_v7 = vpack.i.bf16 %v428_v4, %v396_v3 }
  0x2a   : > { %v410_v58 = vld [vmem:[%s1781_s26 + $0x148] sm:$0xff]  ;;  %v411_v0 = vld [vmem:[%s1781_s26 + $0x150] sm:$0xff]  ;;  %v412_v6 = vld [vmem:[%s1781_s26 + $0x158] sm:$0xff] }
  0x2b   : > { %1476 = vxpose.xlu0.b32.cont [4/16] (narrow) %v1475_v22, 16  ;;  %v1529_v60 = vpack.i.bf16 %v410_v58, %v378_v57  ;;  %v1531_v2 = vpack.i.bf16 %v411_v0, %v379_v63  ;;  %v1533_v8 = vpack.i.bf16 %v412_v6, %v380_v5  ;;  %v397_v9 = vld [vmem:[%s1781_s26 + $0xe0] sm:$0xff]  ;;  %v398_v15 = vld [vmem:[%s1781_s26 + $0xe8] sm:$0xff]  ;;  %v399_v21 = vld [vmem:[%s1781_s26 + $0xf0] sm:$0xff] }
  0x2c   : > { %v429_v10 = vld [vmem:[%s1781_s26 + $0x1e0] sm:$0xff]  ;;  %v430_v16 = vld [vmem:[%s1781_s26 + $0x1e8] sm:$0xff]  ;;  %v431_v22 = vld [vmem:[%s1781_s26 + $0x1f0] sm:$0xff] }
  0x2d   : > { %1518 = vxpose.xlu1.b32.cont [4/16] (narrow) %v1517_v23, 16  ;;  %v381_v11 = vld [vmem:[%s1781_s26 + $0x60] sm:$0xff]  ;;  %v1493_v13 = vpack.i.bf16 %v429_v10, %v397_v9  ;;  %v382_v17 = vld [vmem:[%s1781_s26 + $0x68] sm:$0xff]  ;;  %v1495_v19 = vpack.i.bf16 %v430_v16, %v398_v15  ;;  %v383_v23 = vld [vmem:[%s1781_s26 + $0x70] sm:$0xff]  ;;  %v1497_v25 = vpack.i.bf16 %v431_v22, %v399_v21 }
  0x2e   : > { %v413_v12 = vld [vmem:[%s1781_s26 + $0x160] sm:$0xff]  ;;  %v414_v18 = vld [vmem:[%s1781_s26 + $0x168] sm:$0xff]  ;;  %v415_v24 = vld [vmem:[%s1781_s26 + $0x170] sm:$0xff] }
  0x2f   : > { %1478 = vxpose.xlu0.b32.cont [5/16] (narrow) %v1477_v29, 16  ;;  %v1535_v14 = vpack.i.bf16 %v413_v12, %v381_v11  ;;  %v1537_v20 = vpack.i.bf16 %v414_v18, %v382_v17  ;;  %v1539_v26 = vpack.i.bf16 %v415_v24, %v383_v23  ;;  %v400_v27 = vld [vmem:[%s1781_s26 + $0xf8] sm:$0xff]  ;;  %v570_v34 = vld [vmem:[%s2075_s2 + $0x8] sm:$0xff]  ;;  %v569_v37 = vld [vmem:[%s2075_s2] sm:$0xff] }
  0x30   : > { %v432_v29 = vld [vmem:[%s1781_s26 + $0x1f8] sm:$0xff]  ;;  %v744_v38 = vld [vmem:[%s2077_s4] sm:$0xff]  ;;  %v745_v39 = vld [vmem:[%s2077_s4 + $0x8] sm:$0xff] }
  0x31   : > { %1520 = vxpose.xlu1.b32.cont [5/16] (narrow) %v1519_v30, 16  ;;  %v384_v30 = vld [vmem:[%s1781_s26 + $0x78] sm:$0xff]  ;;  %v1499_v32 = vpack.i.bf16 %v432_v29, %v400_v27  ;;  %v746_v40 = vld [vmem:[%s2077_s4 + $0x10] sm:$0xff] }
  0x32   : > { %v416_v31 = vld [vmem:[%s1781_s26 + $0x178] sm:$0xff]  ;;  %s1963_s26 = sand.u32 1, %s1661_s10  }
  0x33   : > { %1480 = vxpose.xlu0.b32.cont [6/16] (narrow) %v1479_v35, 16  ;;  %v1541_v33 = vpack.i.bf16 %v416_v31, %v384_v30  ;;  %v571_v35 = vld [vmem:[%s2075_s2 + $0x10] sm:$0xff]  ;;  %s2083_s27 = sshll.u32 %s1963_s26, 2  ;;  %s1258_s22 = scalar_lea.sflag [#allocation5], %s1963_s26 }
  0x34   : > { %s353_s28 = scalar_lea.vmem [#allocation4], %s2083_s27 }
  0x35   : > { %1522 = vxpose.xlu1.b32.cont [6/16] (narrow) %v1521_v36, 16  ;;  %v572_v36 = vld [vmem:[%s2075_s2 + $0x18] sm:$0xff]  ;;  %s1286_s29 = sshll.u32 %s353_s28, 4  ;;  %s1993_s29 = int_to_ptr.vmem [resolvable:$true] %s1286_s29 }
  0x36   : > { %s1575_s23 = scalar_lea.vmem %s1993_s29, 64  ;;  %p1582_p1 = scmp.lt.s32.totalorder %s1993_s29, %s1580_s25 }
  0x37   : > { %1482 = vxpose.xlu0.b32.cont [7/16] (narrow) %v1481_v41, 16  ;;  %v747_v41 = vld [vmem:[%s2077_s4 + $0x18] sm:$0xff]  ;;  %p1576_p12 = scmp.ne.s32.totalorder %s1993_s29, %s1575_s23 }
  0x39   : > { %1524 = vxpose.xlu1.b32.cont [7/16] (narrow) %v1523_v42, 16  ;;  %v916_v42 = vld [vmem:[%s2079_s6] sm:$0xff]  ;;  %p1577_p13 = pnand %p1576_p12, %p1763_p5 }
  0x3b   : > { %1484 = vxpose.xlu0.b32.cont [8/16] (narrow) %v1483_v47, 16  ;;  %p1578_p0 = pneg %p1577_p13 }
  0x3d   : > { %1526 = vxpose.xlu1.b32.cont [8/16] (narrow) %v1525_v48, 16 }
  0x3f   : > { %1486 = vxpose.xlu0.b32.cont [9/16] (narrow) %v1485_v53, 16 }
  0x41   : > { %1528 = vxpose.xlu1.b32.cont [9/16] (narrow) %v1527_v54, 16 }
  0x43   : > { %1488 = vxpose.xlu0.b32.cont [10/16] (narrow) %v1487_v59, 16  ;;  %v1555_v59 = vld [vmem:[%s2074_s1] sm:$0xff]  }
  0x45   : > { %1530 = vxpose.xlu1.b32.cont [10/16] (narrow) %v1529_v60, 16  ;;  %v1556_v60 = vld [vmem:[%s2074_s1 + $0x8] sm:$0xff]  }
  0x47   : > { %1490 = vxpose.xlu0.b32.cont [11/16] (narrow) %v1489_v1, 16 }
  0x49   : > { %1532 = vxpose.xlu1.b32.cont [11/16] (narrow) %v1531_v2, 16 }
  0x4b   : > { %1492 = vxpose.xlu0.b32.cont [12/16] (narrow) %v1491_v7, 16 }
  0x4d   : > { %1534 = vxpose.xlu1.b32.cont [12/16] (narrow) %v1533_v8, 16 }
  0x4f   : > { %1494 = vxpose.xlu0.b32.cont [13/16] (narrow) %v1493_v13, 16 }
  0x51   : > { %1536 = vxpose.xlu1.b32.cont [13/16] (narrow) %v1535_v14, 16 }
  0x53   : > { %1496 = vxpose.xlu0.b32.cont [14/16] (narrow) %v1495_v19, 16 }
  0x55   : > { %1538 = vxpose.xlu1.b32.cont [14/16] (narrow) %v1537_v20, 16 }
  0x57   : > { %1498 = vxpose.xlu0.b32.cont [15/16] (narrow) %v1497_v25, 16 }
  0x59   : > { %1540 = vxpose.xlu1.b32.cont [15/16] (narrow) %v1539_v26, 16 }
  0x5b   : > { %1500 = vxpose.xlu0.b32.end [16/16] (narrow) %v1499_v32, 16 }
  0x5d   : > { %1542 = vxpose.xlu1.b32.end [16/16] (narrow) %v1541_v33, 16 }
  0x7b   : > { %1554 = vset.pattern.permute.xlu1 %v1671_v28 }
  0x7c   : > { %580 = vperm.xlu1 %1554, %v570_v34  }
  0x80   : > { %585 = vperm.xlu1 %1554, %v571_v35  }
  0x84   : > { %590 = vperm.xlu1 %1554, %v572_v36   ;;  %1553 = vset.pattern.permute.xlu0 %v1671_v28 }
  0x85   : > { %575 = vperm.xlu0 %1553, %v569_v37  }
  0x88   : > { %750 = vperm.xlu1 %1554, %v744_v38  }
  0x89   : > { %755 = vperm.xlu0 %1553, %v745_v39  }
  0x8c   : > { %760 = vperm.xlu1 %1554, %v746_v40  }
  0x8d   : > { %765 = vperm.xlu0 %1553, %v747_v41  }
  0x90   : > { %919 = vperm.xlu1 %1554, %v916_v42  }
  0x9f   : > { %v1501_v43 = vpop.trf.xlu0 }
  0xa0   : > { %v1502_v46 = vunpack.i.l.bf16 %v1501_v43  ;;  %v1505_v47 = vunpack.i.h.bf16 %v1501_v43 }
  0xa1   : > { %v1543_v44 = vpop.trf.xlu1 }
  0xa2   : > { %v1544_v48 = vunpack.i.l.bf16 %v1543_v44  ;;  %v1547_v49 = vunpack.i.h.bf16 %v1543_v44 }
  0xa3   : > { %v1506_v45 = vpop.trf.xlu0 }
  0xa4   : > { %v1507_v51 = vunpack.i.l.bf16 %v1506_v45  ;;  %v1510_v52 = vunpack.i.h.bf16 %v1506_v45 }
  0xa5   : > { %v1548_v50 = vpop.trf.xlu1 }
  0xa6   : > { %v1549_v53 = vunpack.i.l.bf16 %v1548_v50  ;;  %v1552_v54 = vunpack.i.h.bf16 %v1548_v50  ;;  %v562_v55 = vpack.c.bf16 %v1507_v51, %v1502_v46  ;;  %v564_v56 = vpack.c.bf16 %v1510_v52, %v1505_v47 }
  0xa8   : > { %v561_v57 = vpack.c.bf16 %v1549_v53, %v1544_v48  ;;  %v563_v58 = vpack.c.bf16 %v1552_v54, %v1547_v49  ;;  %610 = vmatprep.subr.bf16.mxu0 %v562_v55  ;;  %663 = vmatprep.subr.bf16.mxu1 %v564_v56 }
  0xaa   : > { %611 = vmatpush1.bf16.msra.mxu0 %v561_v57  ;;  %664 = vmatpush1.bf16.msra.mxu1 %v563_v58  ;;  %v1557_v58 = vld [vmem:[%s2076_s3] sm:$0xff]  }
  0xad   : > { %1401 = vmatmul.mubr.msk.bf16.vlgmr.msra.gmra.mrb[0].mxu0 %vm603_vm0, %v1555_v59  ;;  %1403 = vmatmul.mubr.msk.bf16.vlgmr.msra.gmra.mrb[0].mxu1 %vm603_vm0, %v1555_v59  ;;  %v1558_v59 = vld [vmem:[%s2076_s3 + $0x8] sm:$0xff]  }
  0xae   : > { %652 = vmatprep.mubr.bf16.mxu0 %v1671_v28  ;;  %705 = vmatprep.mubr.bf16.mxu1 %v1671_v28 }
  0xb5   : > { %1402 = vmatmul.mubr.msk.bf16.gmra.mrb[4].mxu0 %vm603_vm0, %v1556_v60  ;;  %1404 = vmatmul.mubr.msk.bf16.gmra.mrb[4].mxu1 %vm603_vm0, %v1556_v60 }
  0xb6   : > { %817 = vmatprep.mubr.bf16.mxu0 %v1671_v28  ;;  %870 = vmatprep.mubr.bf16.mxu1 %v1671_v28 }
  0xfb   : > { %v581_v61 = vpop.permute.xlu1 %580 }
  0xff   : > { %v586_v63 = vpop.permute.xlu1 %585 }
 0x103   : > { %v591_v24 = vpop.permute.xlu1 %590 }
 0x104   : > { %v576_v62 = vpop.permute.xlu0 %575 }
 0x107   : > { %v751_v60 = vpop.permute.xlu1 %750 }
 0x180   : > { %v644_v0 = vpop.f32.mrb[0].mxu0  ;;  %v697_v1 = vpop.f32.mrb[0].mxu1 }
 0x181   : > { %v645_v2 = vadd.f32 %v644_v0, %v576_v62  ;;  %v698_v3 = vadd.f32 %v697_v1, %v576_v62  ;;  %v646_v4 = vpop.f32.mrb[1].mxu0  ;;  %v699_v5 = vpop.f32.mrb[1].mxu1 }
 0x182   : > { %v647_v6 = vadd.f32 %v646_v4, %v576_v62  ;;  %v700_v7 = vadd.f32 %v699_v5, %v576_v62  ;;  %v648_v8 = vpop.f32.mrb[2].mxu0  ;;  %v701_v9 = vpop.f32.mrb[2].mxu1 }
 0x183   : > { %v649_v10 = vadd.f32 %v648_v8, %v581_v61  ;;  %v702_v11 = vadd.f32 %v701_v9, %v581_v61  ;;  %v650_v12 = vpop.f32.mrb[3].mxu0  ;;  %v703_v13 = vpop.f32.mrb[3].mxu1  ;;  %v716_v16 = vmax.f32 %v645_v2, 0.0  ;;  %v718_v17 = vmax.f32 %v698_v3, 0.0 }
 0x184   : > { %v651_v14 = vadd.f32 %v650_v12, %v581_v61  ;;  %v704_v15 = vadd.f32 %v703_v13, %v581_v61  ;;  %v717_v20 = vmax.f32 %v647_v6, 0.0  ;;  %v719_v21 = vmax.f32 %v700_v7, 0.0  ;;  %v756_v61 = vpop.permute.xlu0 %755 }
 0x185   : > { %v720_v18 = vmax.f32 %v649_v10, 0.0  ;;  %v722_v19 = vmax.f32 %v702_v11, 0.0 }
 0x186   : > { %v721_v22 = vmax.f32 %v651_v14, 0.0  ;;  %v723_v23 = vmax.f32 %v704_v15, 0.0 }
 0x187   : > { %v736_v25 = vpack.c.bf16 %v720_v18, %v716_v16  ;;  %v738_v26 = vpack.c.bf16 %v722_v19, %v718_v17 }
 0x188   : > { %v737_v27 = vpack.c.bf16 %v721_v22, %v717_v20  ;;  %v739_v29 = vpack.c.bf16 %v723_v23, %v719_v21  ;;  %v654_v30 = vpop.f32.mrb[4].mxu0  ;;  %v707_v31 = vpop.f32.mrb[4].mxu1 }
 0x189   : > { %v655_v32 = vadd.f32 %v654_v30, %v586_v63  ;;  %v708_v33 = vadd.f32 %v707_v31, %v586_v63  ;;  %v656_v34 = vpop.f32.mrb[5].mxu0  ;;  %v709_v35 = vpop.f32.mrb[5].mxu1 }
 0x18a   : > { %v657_v36 = vadd.f32 %v656_v34, %v586_v63  ;;  %v710_v37 = vadd.f32 %v709_v35, %v586_v63  ;;  %v658_v38 = vpop.f32.mrb[6].mxu0  ;;  %v711_v39 = vpop.f32.mrb[6].mxu1  ;;  %785 = vmatprep.subr.bf16.mxu0 %v737_v27  ;;  %838 = vmatprep.subr.bf16.mxu1 %v739_v29 }
 0x18b   : > { %v659_v40 = vadd.f32 %v658_v38, %v591_v24  ;;  %v712_v41 = vadd.f32 %v711_v39, %v591_v24  ;;  %v660_v42 = vpop.f32.mrb[7].mxu0  ;;  %v713_v43 = vpop.f32.mrb[7].mxu1  ;;  %786 = vmatpush1.bf16.msra.mxu0 %v736_v25  ;;  %839 = vmatpush1.bf16.msra.mxu1 %v738_v26  ;;  %v724_v46 = vmax.f32 %v655_v32, 0.0  ;;  %v726_v47 = vmax.f32 %v708_v33, 0.0 }
 0x18c   : > { %v661_v44 = vadd.f32 %v660_v42, %v591_v24  ;;  %v714_v45 = vadd.f32 %v713_v43, %v591_v24  ;;  %v725_v50 = vmax.f32 %v657_v36, 0.0  ;;  %v727_v51 = vmax.f32 %v710_v37, 0.0  ;;  %v761_v21 = vpop.permute.xlu1 %760  ;;  %v766_v22 = vpop.permute.xlu0 %765 }
 0x18d   : > { %v728_v48 = vmax.f32 %v659_v40, 0.0  ;;  %v730_v49 = vmax.f32 %v712_v41, 0.0 }
 0x18e   : > { %v729_v52 = vmax.f32 %v661_v44, 0.0  ;;  %v731_v53 = vmax.f32 %v714_v45, 0.0 }
 0x18f   : > { %v740_v54 = vpack.c.bf16 %v728_v48, %v724_v46  ;;  %v742_v55 = vpack.c.bf16 %v730_v49, %v726_v47 }
 0x190   : > { %v741_v56 = vpack.c.bf16 %v729_v52, %v725_v50  ;;  %v743_v57 = vpack.c.bf16 %v731_v53, %v727_v51 }
 0x192   : > { %787 = vmatprep.subr.bf16.mxu0 %v741_v56  ;;  %840 = vmatprep.subr.bf16.mxu1 %v743_v57  ;;  %v907_v56 = vld [vmem:[%s2078_s5] sm:$0xf]  ;;  %v920_v57 = vpop.permute.xlu1 %919 }
 0x193   : > { %788 = vmatpush1.bf16.msra.mxu0 %v740_v54  ;;  %841 = vmatpush1.bf16.msra.mxu1 %v742_v55 }
 0x196   : > { %1407 = vmatmul.mubr.msk.bf16.vlgmr.msra.gmra.mrb[8].mxu0 %vm778_vm1, %v1557_v58  ;;  %1409 = vmatmul.mubr.msk.bf16.vlgmr.msra.gmra.mrb[8].mxu1 %vm778_vm1, %v1557_v58 }
 0x197   : > { %827 = vmatprep.mubr.bf16.mxu0 %v1671_v28  ;;  %880 = vmatprep.mubr.bf16.mxu1 %v1671_v28 }
 0x19e   : > { %1408 = vmatmul.mubr.msk.bf16.gmra.mrb[12].mxu0 %vm778_vm1, %v1558_v59  ;;  %1410 = vmatmul.mubr.msk.bf16.gmra.mrb[12].mxu1 %vm778_vm1, %v1558_v59 }
 0x19f   : > { %957 = vmatprep.mubr.bf16.mxu0 %v1671_v28  ;;  %998 = vmatprep.mubr.bf16.mxu1 %v1671_v28 }
 0x269   : > { %v819_v62 = vpop.f32.mrb[8].mxu0  ;;  %v872_v63 = vpop.f32.mrb[8].mxu1 }
 0x26a   : > { %v820_v0 = vadd.f32 %v819_v62, %v751_v60  ;;  %v873_v1 = vadd.f32 %v872_v63, %v751_v60  ;;  %v821_v2 = vpop.f32.mrb[9].mxu0  ;;  %v874_v3 = vpop.f32.mrb[9].mxu1 }
 0x26b   : > { %v822_v4 = vadd.f32 %v821_v2, %v751_v60  ;;  %v875_v5 = vadd.f32 %v874_v3, %v751_v60  ;;  %v823_v6 = vpop.f32.mrb[10].mxu0  ;;  %v876_v7 = vpop.f32.mrb[10].mxu1 }
 0x26c   : > { %v824_v8 = vadd.f32 %v823_v6, %v756_v61  ;;  %v877_v9 = vadd.f32 %v876_v7, %v756_v61  ;;  %v825_v10 = vpop.f32.mrb[11].mxu0  ;;  %v878_v11 = vpop.f32.mrb[11].mxu1  ;;  %v891_v14 = vmax.f32 %v820_v0, 0.0  ;;  %v893_v28 = vmax.f32 %v873_v1, 0.0 }
 0x26d   : > { %v826_v12 = vadd.f32 %v825_v10, %v756_v61  ;;  %v879_v13 = vadd.f32 %v878_v11, %v756_v61  ;;  %v892_v17 = vmax.f32 %v822_v4, 0.0  ;;  %v894_v18 = vmax.f32 %v875_v5, 0.0 }
 0x26e   : > { %v895_v15 = vmax.f32 %v824_v8, 0.0  ;;  %v897_v16 = vmax.f32 %v877_v9, 0.0 }
 0x26f   : > { %v896_v19 = vmax.f32 %v826_v12, 0.0  ;;  %v898_v20 = vmax.f32 %v879_v13, 0.0 }
 0x270   : > { %v908_v23 = vpack.c.bf16 %v895_v15, %v891_v14  ;;  %v910_v24 = vpack.c.bf16 %v897_v16, %v893_v28 }
 0x271   : > { %v909_v25 = vpack.c.bf16 %v896_v19, %v892_v17  ;;  %v911_v26 = vpack.c.bf16 %v898_v20, %v894_v18  ;;  %v829_v27 = vpop.f32.mrb[12].mxu0  ;;  %v882_v29 = vpop.f32.mrb[12].mxu1 }
 0x272   : > { %v830_v30 = vadd.f32 %v829_v27, %v761_v21  ;;  %v883_v31 = vadd.f32 %v882_v29, %v761_v21  ;;  %v831_v32 = vpop.f32.mrb[13].mxu0  ;;  %v884_v33 = vpop.f32.mrb[13].mxu1 }
 0x273   : > { %v832_v34 = vadd.f32 %v831_v32, %v761_v21  ;;  %v885_v35 = vadd.f32 %v884_v33, %v761_v21  ;;  %v833_v36 = vpop.f32.mrb[14].mxu0  ;;  %v886_v37 = vpop.f32.mrb[14].mxu1  ;;  %925 = vmatprep.subr.bf16.mxu0 %v909_v25  ;;  %966 = vmatprep.subr.bf16.mxu1 %v911_v26 }
 0x274   : > { %v834_v38 = vadd.f32 %v833_v36, %v766_v22  ;;  %v887_v39 = vadd.f32 %v886_v37, %v766_v22  ;;  %v835_v40 = vpop.f32.mrb[15].mxu0  ;;  %v888_v41 = vpop.f32.mrb[15].mxu1  ;;  %926 = vmatpush1.bf16.msra.mxu0 %v908_v23  ;;  %967 = vmatpush1.bf16.msra.mxu1 %v910_v24  ;;  %v899_v44 = vmax.f32 %v830_v30, 0.0  ;;  %v901_v45 = vmax.f32 %v883_v31, 0.0 }
 0x275   : > { %v836_v42 = vadd.f32 %v835_v40, %v766_v22  ;;  %v889_v43 = vadd.f32 %v888_v41, %v766_v22  ;;  %v900_v48 = vmax.f32 %v832_v34, 0.0  ;;  %v902_v49 = vmax.f32 %v885_v35, 0.0 }
 0x276   : > { %v903_v46 = vmax.f32 %v834_v38, 0.0  ;;  %v905_v47 = vmax.f32 %v887_v39, 0.0 }
 0x277   : > { %v904_v50 = vmax.f32 %v836_v42, 0.0  ;;  %v906_v51 = vmax.f32 %v889_v43, 0.0 }
 0x278   : > { %v912_v52 = vpack.c.bf16 %v903_v46, %v899_v44  ;;  %v914_v53 = vpack.c.bf16 %v905_v47, %v901_v45 }
 0x279   : > { %v913_v54 = vpack.c.bf16 %v904_v50, %v900_v48  ;;  %v915_v55 = vpack.c.bf16 %v906_v51, %v902_v49 }
 0x27b   : > { %927 = vmatprep.subr.bf16.mxu0 %v913_v54  ;;  %968 = vmatprep.subr.bf16.mxu1 %v915_v55 }
 0x27c   : > { %928 = vmatpush1.bf16.msra.mxu0 %v912_v52  ;;  %969 = vmatpush1.bf16.msra.mxu1 %v914_v53 }
 0x27f   : > { %1411 = vmatmul.mubr.msk.bf16.vlgmr.msra.gmra.mrb[16].mxu0 %vm778_vm1, %v907_v56  ;;  %1412 = vmatmul.mubr.msk.bf16.vlgmr.msra.gmra.mrb[16].mxu1 %vm778_vm1, %v907_v56 }
 0x352   : > { %v959_v58 = vpop.f32.mrb[16].mxu0  ;;  %v1000_v59 = vpop.f32.mrb[16].mxu1 }
 0x353   : > { %v1907_v60 = vadd.f32 %v959_v58, %v920_v57  ;;  %v1909_v61 = vadd.f32 %v1000_v59, %v920_v57  ;;  %v961_v62 = vpop.f32.mrb[17].mxu0  ;;  %v1002_v63 = vpop.f32.mrb[17].mxu1 }
 0x354   : > { %v1911_v0 = vadd.f32 %v961_v62, %v920_v57  ;;  %v1913_v1 = vadd.f32 %v1002_v63, %v920_v57  ;;  %v963_v2 = vpop.f32.mrb[18].mxu0  ;;  %v1004_v3 = vpop.f32.mrb[18].mxu1 }
 0x355   : > { %v1007_v4 = vrot.slane %v1907_v60, 4  ;;  %v1019_v5 = vrot.slane %v1909_v61, 4  ;;  %v964_v6 = vpop.f32.mrb[19].mxu0  ;;  %v1005_v7 = vpop.f32.mrb[19].mxu1 }
 0x356   : > { %v1013_v8 = vrot.slane %v1911_v0, 4  ;;  %v1025_v9 = vrot.slane %v1913_v1, 4 }
 0x357   : > { %v1008_v10 = vmax.f32 %v1907_v60, %v1007_v4  ;;  %v1020_v11 = vmax.f32 %v1909_v61, %v1019_v5 }
 0x358   : > { %v1014_v12 = vmax.f32 %v1911_v0, %v1013_v8  ;;  %v1026_v13 = vmax.f32 %v1913_v1, %v1025_v9 }
 0x359   : > { %v1009_v14 = vrot.slane %v1008_v10, 2  ;;  %v1021_v28 = vrot.slane %v1020_v11, 2 }
 0x35a   : > { %v1015_v15 = vrot.slane %v1014_v12, 2  ;;  %v1027_v16 = vrot.slane %v1026_v13, 2 }
 0x35b   : > { %v1010_v17 = vmax.f32 %v1008_v10, %v1009_v14  ;;  %v1022_v18 = vmax.f32 %v1020_v11, %v1021_v28  ;;  %v1083_v14 = vld [vmem:[%s364_s13] sm:$0xff] }
 0x35c   : > { %v1016_v19 = vmax.f32 %v1014_v12, %v1015_v15  ;;  %v1028_v20 = vmax.f32 %v1026_v13, %v1027_v16 }
 0x35d   : > { %v1011_v21 = vrot.slane %v1010_v17, 1  ;;  %v1023_v22 = vrot.slane %v1022_v18, 1 }
 0x35e   : > { %v1017_v23 = vrot.slane %v1016_v19, 1  ;;  %v1029_v24 = vrot.slane %v1028_v20, 1 }
 0x35f   : > { %v1012_v25 = vmax.f32 %v1010_v17, %v1011_v21  ;;  %v1024_v26 = vmax.f32 %v1022_v18, %v1023_v22  ;;  %v1085_v17 = vld [vmem:[%s364_s13 + $0x10] sm:$0xff] }
 0x360   : > { %v1923_v27 = vmax.f32 %v1016_v19, %v1017_v23  ;;  %v1925_v29 = vmax.f32 %v1028_v20, %v1029_v24  ;;  %v1084_v20 = vld [vmem:[%s364_s13 + $0x8] sm:$0xff]  ;;  %v1086_v24 = vld [vmem:[%s364_s13 + $0x18] sm:$0xff]  ;;  %s1581_s13 = scalar_lea.vmem %s1580_s25, 128 }
 0x361   : > { %v1031_v30 = vsub.f32 %v1907_v60, %v1012_v25  ;;  %v1033_v31 = vsub.f32 %v1909_v61, %v1024_v26  ;;  %p1583_p2 = scmp.lt.s32.totalorder %s1581_s13, %s1575_s23 }
 0x362   : > { %v1032_v32 = vsub.f32 %v1911_v0, %v1923_v27  ;;  %v1034_v33 = vsub.f32 %v1913_v1, %v1925_v29 }
 0x363   : > { %v1035_v34 = vmul.f32 1.442695, %v1031_v30  ;;  %v1039_v35 = vmul.f32 1.442695, %v1033_v31  ;;  %p1584_p3 = por %p1583_p2, %p1582_p1 }
 0x364   : > { %v1037_v36 = vmul.f32 1.442695, %v1032_v32  ;;  %v1041_v37 = vmul.f32 1.442695, %v1034_v33 }
 0x365   : > { %1559 = vpow2.f32 %v1035_v34  ;;  %p1585_p4 = pnand %p1584_p3, %p1578_p0 }
 0x366   : > { %1561 = vpow2.f32 %v1039_v35 }
 0x367   : > { %1563 = vpow2.f32 %v1037_v36 }
 0x368   : > { %1565 = vpow2.f32 %v1041_v37  ;;  %v1115_v37 = vlaneseq }
 0x36f   : > { %v1560_v38 = vpop.eup %1559 }
 0x370   : > { %v1562_v39 = vpop.eup %1561  ;;  %v1043_v40 = vrot.slane %v1560_v38, 4 }
 0x371   : > { %v1564_v41 = vpop.eup %1563  ;;  %v1055_v42 = vrot.slane %v1562_v39, 4 }
 0x372   : > { %v1566_v43 = vpop.eup %1565  ;;  %v1044_v44 = vadd.f32 %v1560_v38, %v1043_v40  ;;  %v1049_v45 = vrot.slane %v1564_v41, 4 }
 0x373   : > { %v1056_v46 = vadd.f32 %v1562_v39, %v1055_v42  ;;  %v1061_v47 = vrot.slane %v1566_v43, 4 }
 0x374   : > { %v1045_v48 = vrot.slane %v1044_v44, 2  ;;  %v1050_v49 = vadd.f32 %v1564_v41, %v1049_v45  ;;  %v1956_v45 = vshrl.u32 %v1115_v37, 7 }
 0x375   : > { %v1057_v50 = vrot.slane %v1056_v46, 2  ;;  %v1062_v51 = vadd.f32 %v1566_v43, %v1061_v47 }
 0x376   : > { %v1046_v52 = vadd.f32 %v1045_v48, %v1044_v44  ;;  %v1051_v53 = vrot.slane %v1050_v49, 2 }
 0x377   : > { %v1058_v54 = vadd.f32 %v1057_v50, %v1056_v46  ;;  %v1063_v55 = vrot.slane %v1062_v51, 2 }
 0x378   : > { %v1047_v56 = vrot.slane %v1046_v52, 1  ;;  %v1052_v57 = vadd.f32 %v1051_v53, %v1050_v49 }
 0x379   : > { %v1059_v58 = vrot.slane %v1058_v54, 1  ;;  %v1064_v59 = vadd.f32 %v1063_v55, %v1062_v51 }
 0x37a   : > { %v1048_v62 = vadd.f32 %v1047_v56, %v1046_v52  ;;  %v1053_v63 = vrot.slane %v1052_v57, 1 }
 0x37b   : > { %v1060_v2 = vadd.f32 %v1059_v58, %v1058_v54  ;;  %v1065_v3 = vrot.slane %v1064_v59, 1 }
 0x37c   : > { %1567 = vlog2.f32 %v1048_v62  ;;  %v1054_v4 = vadd.f32 %v1053_v63, %v1052_v57 }
 0x37d   : > { %1569 = vlog2.f32 %v1060_v2  ;;  %v1066_v5 = vadd.f32 %v1065_v3, %v1064_v59  ;;  %v1672_v3 = vmov 1966171168  }
 0x37e   : > { %1571 = vlog2.f32 %v1054_v4  ;;  %v1200_v4 = vunpack.c.l.s4 %v1672_v3 }
 0x37f   : > { %1573 = vlog2.f32 %v1066_v5 }
 0x386   : > { %v1568_v6 = vpop.eup %1567 }
 0x387   : > { %v1570_v7 = vpop.eup %1569  ;;  %v1068_v8 = vmul.f32 0.6931472, %v1568_v6 }
 0x388   : > { %v1572_v9 = vpop.eup %1571  ;;  %v1072_v10 = vmul.f32 0.6931472, %v1570_v7 }
 0x389   : > { %v1574_v11 = vpop.eup %1573  ;;  %v1075_v12 = vadd.f32 %v1068_v8, %v1012_v25  ;;  %v1070_v13 = vmul.f32 0.6931472, %v1572_v9 }
 0x38a   : > { %v1077_v28 = vadd.f32 %v1072_v10, %v1024_v26  ;;  %v1074_v15 = vmul.f32 0.6931472, %v1574_v11 }
 0x38b   : > { %v1938_v16 = vsub.f32 %v1907_v60, %v1075_v12  ;;  %v1076_v18 = vadd.f32 %v1070_v13, %v1923_v27  ;;  %v1201_v13 = vunpack.c.0.s8 %v1200_v4 }
 0x38c   : > { %v1942_v19 = vsub.f32 %v1909_v61, %v1077_v28  ;;  %v1078_v21 = vadd.f32 %v1074_v15, %v1925_v29 }
 0x38d   : > { %v1087_v22 = vadd.f32 %v1083_v14, %v1938_v16  ;;  %v1947_v23 = vsub.f32 %v1911_v0, %v1076_v18 }
 0x38e   : > { %v1089_v25 = vadd.f32 %v1085_v17, %v1942_v19  ;;  %v1951_v60 = vsub.f32 %v1913_v1, %v1078_v21 }
 0x38f   : > { %v1091_v26 = vrot.slane %v1087_v22, 4  ;;  %v1088_v27 = vadd.f32 %v1084_v20, %v1947_v23 }
 0x390   : > { %v1103_v30 = vrot.slane %v1089_v25, 4  ;;  %v1090_v61 = vadd.f32 %v1086_v24, %v1951_v60 }
 0x391   : > { %v1092_v31 = vmax.f32 %v1087_v22, %v1091_v26  ;;  %v1097_v32 = vrot.slane %v1088_v27, 4 }
 0x392   : > { %v1104_v29 = vmax.f32 %v1089_v25, %v1103_v30  ;;  %v1109_v33 = vrot.slane %v1090_v61, 4 }
 0x393   : > { %v1093_v34 = vrot.slane %v1092_v31, 2  ;;  %v1098_v35 = vmax.f32 %v1088_v27, %v1097_v32 }
 0x394   : > { %v1105_v0 = vrot.slane %v1104_v29, 2  ;;  %v1110_v36 = vmax.f32 %v1090_v61, %v1109_v33 }
 0x395   : > { %v1094_v38 = vmax.f32 %v1092_v31, %v1093_v34  ;;  %v1099_v39 = vrot.slane %v1098_v35, 2 }
 0x396   : > { %v1106_v40 = vmax.f32 %v1104_v29, %v1105_v0  ;;  %v1111_v1 = vrot.slane %v1110_v36, 2 }
 0x397   : > { %v1095_v41 = vrot.slane %v1094_v38, 1  ;;  %v1100_v42 = vmax.f32 %v1098_v35, %v1099_v39 }
 0x398   : > { %v1107_v43 = vrot.slane %v1106_v40, 1  ;;  %v1112_v44 = vmax.f32 %v1110_v36, %v1111_v1 }
 0x399   : > { %v1096_v46 = vmax.f32 %v1094_v38, %v1095_v41  ;;  %v1101_v47 = vrot.slane %v1100_v42, 1 }
 0x39a   : > { %v1108_v48 = vmax.f32 %v1106_v40, %v1107_v43  ;;  %v1113_v49 = vrot.slane %v1112_v44, 1 }
 0x39b   : > { %vm1117_vm2 = vcmp.eq.f32.partialorder %v1087_v22, %v1096_v46  ;;  %v1102_v50 = vmax.f32 %v1100_v42, %v1101_v47  ;;  %v1967_v22 = vsub.s32 %v1201_v13, %v1956_v45 }
 0x39c   : > { %vm1119_vm3 = vcmp.eq.f32.partialorder %v1089_v25, %v1108_v48  ;;  %v1114_v51 = vmax.f32 %v1112_v44, %v1113_v49  ;;  %v1121_v52 = vsel %vm1117_vm2, %v1956_v45, 8 }
 0x39d   : > { %vm1118_vm4 = vcmp.eq.f32.partialorder %v1088_v27, %v1102_v50  ;;  %v1123_v53 = vsel %vm1119_vm3, %v1956_v45, 8  ;;  %v1125_v54 = vrot.slane %v1121_v52, 4 }
 0x39e   : > { %vm1120_vm5 = vcmp.eq.f32.partialorder %v1090_v61, %v1114_v51  ;;  %v1122_v55 = vsel %vm1118_vm4, %v1956_v45, 8  ;;  %v1143_v56 = vrot.slane %v1123_v53, 4 }
 0x39f   : > { %v1124_v57 = vsel %vm1120_vm5, %v1956_v45, 8  ;;  %vm1126_vm6 = vcmp.lt.s32.totalorder %v1121_v52, %v1125_v54  ;;  %v1134_v58 = vrot.slane %v1122_v55, 4 }
 0x3a0   : > { %v1127_v59 = vsel %vm1126_vm6, %v1121_v52, %v1125_v54  ;;  %vm1144_vm7 = vcmp.lt.s32.totalorder %v1123_v53, %v1143_v56  ;;  %v1152_v62 = vrot.slane %v1124_v57, 4  ;;  %vm1982_vm6 = vcmp.lt.s32.totalorder %v1115_v37, 512 }
 0x3a1   : > { %v1128_v63 = vrot.slane %v1127_v59, 2  ;;  %vm1135_vm8 = vcmp.lt.s32.totalorder %v1122_v55, %v1134_v58  ;;  %v1145_v2 = vsel %vm1144_vm7, %v1123_v53, %v1143_v56 }
 0x3a2   : > { %v1136_v5 = vsel %vm1135_vm8, %v1122_v55, %v1134_v58  ;;  %v1146_v6 = vrot.slane %v1145_v2, 2  ;;  %vm1153_vm9 = vcmp.lt.s32.totalorder %v1124_v57, %v1152_v62 }
 0x3a3   : > { %vm1129_vm10 = vcmp.lt.s32.totalorder %v1127_v59, %v1128_v63  ;;  %v1137_v7 = vrot.slane %v1136_v5, 2  ;;  %v1154_v8 = vsel %vm1153_vm9, %v1124_v57, %v1152_v62 }
 0x3a4   : > { %v1130_v9 = vsel %vm1129_vm10, %v1127_v59, %v1128_v63  ;;  %vm1147_vm11 = vcmp.lt.s32.totalorder %v1145_v2, %v1146_v6  ;;  %v1155_v10 = vrot.slane %v1154_v8, 2 }
 0x3a5   : > { %v1131_v11 = vrot.slane %v1130_v9, 1  ;;  %vm1138_vm12 = vcmp.lt.s32.totalorder %v1136_v5, %v1137_v7  ;;  %v1148_v12 = vsel %vm1147_vm11, %v1145_v2, %v1146_v6 }
 0x3a6   : > { %v1139_v14 = vsel %vm1138_vm12, %v1136_v5, %v1137_v7  ;;  %v1149_v28 = vrot.slane %v1148_v12, 1  ;;  %vm1156_vm13 = vcmp.lt.s32.totalorder %v1154_v8, %v1155_v10 }
 0x3a7   : > { %vm1132_vm14 = vcmp.lt.s32.totalorder %v1130_v9, %v1131_v11  ;;  %v1140_v15 = vrot.slane %v1139_v14, 1  ;;  %v1157_v17 = vsel %vm1156_vm13, %v1154_v8, %v1155_v10 }
 0x3a8   : > { %v1133_v18 = vsel %vm1132_vm14, %v1130_v9, %v1131_v11  ;;  %vm1150_vm15 = vcmp.lt.s32.totalorder %v1148_v12, %v1149_v28  ;;  %v1158_v20 = vrot.slane %v1157_v17, 1 }
 0x3a9   : > { %vm1141_vm0 = vcmp.lt.s32.totalorder %v1139_v14, %v1140_v15  ;;  %v1151_v21 = vsel %vm1150_vm15, %v1148_v12, %v1149_v28  ;;  %vm1161_vm1 = vcmp.eq.s32.totalorder %v1956_v45, %v1133_v18 }
 0x3aa   : > { %v1142_v24 = vsel %vm1141_vm0, %v1139_v14, %v1140_v15  ;;  %vm1159_vm2 = vcmp.lt.s32.totalorder %v1157_v17, %v1158_v20  ;;  %vm1163_vm3 = vcmp.eq.s32.totalorder %v1956_v45, %v1151_v21  ;;  %v1165_v25 = vsel %vm1161_vm1, %v1938_v16, 0.0 }
 0x3ab   : > { %v1160_v26 = vsel %vm1159_vm2, %v1157_v17, %v1158_v20  ;;  %vm1162_vm4 = vcmp.eq.s32.totalorder %v1956_v45, %v1142_v24  ;;  %v1167_v27 = vsel %vm1163_vm3, %v1942_v19, 0.0  ;;  %v1169_v30 = vrot.slane %v1165_v25, 4 }
 0x3ac   : > { %vm1164_vm5 = vcmp.eq.s32.totalorder %v1956_v45, %v1160_v26  ;;  %v1166_v61 = vsel %vm1162_vm4, %v1947_v23, 0.0  ;;  %v1181_v31 = vrot.slane %v1167_v27, 4  ;;  %v1227_v32 = vcombine.low %v1133_v18, %v1142_v24 }
 0x3ad   : > { %v1168_v29 = vsel %vm1164_vm5, %v1951_v60, 0.0  ;;  %v1170_v33 = vadd.f32 %v1169_v30, %v1165_v25  ;;  %v1175_v34 = vrot.slane %v1166_v61, 4  ;;  %v1228_v35 = vcombine.low %v1151_v21, %v1160_v26 }
 0x3ae   : > { %v1182_v16 = vadd.f32 %v1181_v31, %v1167_v27  ;;  %v1187_v0 = vrot.slane %v1168_v29, 4  ;;  %v1235_v36 = vrot.slane %v1227_v32, %v1967_v22 }
 0x3af   : > { %v1171_v38 = vrot.slane %v1170_v33, 2  ;;  %v1176_v19 = vadd.f32 %v1175_v34, %v1166_v61  ;;  %v1242_v39 = vrot.slane %v1228_v35, %v1967_v22 }
 0x3b0   : > { %v1183_v40 = vrot.slane %v1182_v16, 2  ;;  %v1188_v1 = vadd.f32 %v1187_v0, %v1168_v29 }
 0x3b1   : > { %v1172_v23 = vadd.f32 %v1171_v38, %v1170_v33  ;;  %v1177_v41 = vrot.slane %v1176_v19, 2  ;;  %v1243_v60 = vcombine.low %v1235_v36, %v1242_v39 }
 0x3b2   : > { %v1184_v42 = vadd.f32 %v1183_v40, %v1182_v16  ;;  %v1189_v43 = vrot.slane %v1188_v1, 2 }
 0x3b3   : > { %v1173_v45 = vrot.slane %v1172_v23, 1  ;;  %v1178_v46 = vadd.f32 %v1177_v41, %v1176_v19  ;;  %v1250_v47 = vrot.slane %v1243_v60, %v1967_v22 }
 0x3b4   : > { %v1185_v48 = vrot.slane %v1184_v42, 1  ;;  %v1190_v37 = vadd.f32 %v1189_v43, %v1188_v1 }
 0x3b5   : > { %v1174_v49 = vadd.f32 %v1173_v45, %v1172_v23  ;;  %v1179_v50 = vrot.slane %v1178_v46, 1  ;;  %1251 = vst.msk [vmem:[%s353_s28] sm:$0xf] %vm1982_vm6, %v1250_v47 }
 0x3b6   : > { %v1186_v51 = vadd.f32 %v1185_v48, %v1184_v42  ;;  %v1191_v52 = vrot.slane %v1190_v37, 1 }
 0x3b7   : > { %1588 = shalt.err (!%p1585_p4)
}
 0x3b8   : > { %s1589_s28 = scalar_lea.hbm %s1991_s17, 64  ;;  %s1593_s24 = scalar_lea.hbm %s2082_s9, 128 }
 0x3b9   : > { %p1590_p7 = scmp.ne.s32.totalorder %s1991_s17, %s1589_s28  ;;  %p1594_p10 = scmp.lt.u32.totalorder %s1991_s17, %s2082_s9 }
 0x3ba   : > { %p1595_p11 = scmp.lt.u32.totalorder %s1593_s24, %s1589_s28  ;;  %p1597_p13 = scmp.lt.u32.totalorder %s1589_s28, %s1991_s17 }
 0x3bb   : > { %p1591_p8 = pnand %p1590_p7, %p1763_p5 }
 0x3bc   : > { %p1596_p12 = por %p1595_p11, %p1594_p10 }
 0x3bd   : > { %p1592_p9 = pneg %p1591_p8 }
 0x3be   : > { %p1598_p0 = por %p1597_p13, %p1596_p12 }
 0x3c0   : > { %p1599_p1 = pnand %p1598_p0, %p1592_p9 }
 0x3c2   : > { %1602 = shalt.err (!%p1599_p1)
}
 0x3c3   : > { %1424 = dma.vmem_to_hbm [thread:$0]  (%p1763_p5), %s1993_s29, 64, %s1991_s17, %s1258_s22   ;;  %v1180_v53 = vadd.f32 %v1179_v50, %v1178_v46  ;;  %v1192_v54 = vadd.f32 %v1191_v52, %v1190_v37 }
 0x3c4   : > { %s2088_s27 = sshll.u32 %s1963_s26, 2  ;;  %s2028_s16 = scalar_lea.hbm %s2081_s8, %s1774_s21 }
 0x3c5   : > { %v1197_v55 = vcombine.low %v1174_v49, %v1180_v53  ;;  %v1198_v56 = vcombine.low %v1186_v51, %v1192_v54  ;;  %s346_s23 = scalar_lea.vmem [#allocation2], %s2088_s27  ;;  %s1253_s29 = scalar_lea.sflag [#allocation3], %s1963_s26 }
 0x3c6   : > { %s1272_s13 = sshll.u32 %s346_s23, 4  ;;  %s1674_s22 = smov [#allocation2]   ;;  %s2030_s13 = int_to_ptr.vmem [resolvable:$true] %s1272_s13 }
 0x3c7   : > { %v1205_v57 = vrot.slane %v1197_v55, %v1967_v22  ;;  %v1212_v58 = vrot.slane %v1198_v56, %v1967_v22  ;;  %s1603_s17 = scalar_lea.vmem %s2030_s13, 64  ;;  %s1607_s24 = sshll.u32 %s1674_s22, 4  ;;  %s1608_s24 = int_to_ptr.vmem [resolvable:$false] %s1607_s24 }
 0x3c8   : > { %p1604_p2 = scmp.ne.s32.totalorder %s2030_s13, %s1603_s17  ;;  %s1609_s25 = scalar_lea.vmem %s1608_s24, 128 }
 0x3c9   : > { %v1213_v59 = vcombine.low %v1205_v57, %v1212_v58  ;;  %p1610_p7 = scmp.lt.s32.totalorder %s2030_s13, %s1608_s24  ;;  %p1611_p8 = scmp.lt.s32.totalorder %s1609_s25, %s1603_s17 }
 0x3ca   : > { %p1605_p3 = pnand %p1604_p2, %p1763_p5 }
 0x3cb   : > { %v1220_v62 = vrot.slane %v1213_v59, %v1967_v22  ;;  %p1612_p9 = por %p1611_p8, %p1610_p7 }
 0x3cc   : > { %p1606_p4 = pneg %p1605_p3 }
 0x3cd   : > { %1226 = vst.msk [vmem:[%s346_s23] sm:$0xf] %vm1982_vm6, %v1220_v62 }
 0x3ce   : > { %p1613_p10 = pnand %p1612_p9, %p1606_p4 }
 0x3d0   : > { %1616 = shalt.err (!%p1613_p10)
}
 0x3d1   : > { %s1617_s21 = scalar_lea.hbm %s2028_s16, 64  ;;  %s1621_s23 = scalar_lea.hbm %s2081_s8, 128 }
 0x3d2   : > { %p1618_p11 = scmp.ne.s32.totalorder %s2028_s16, %s1617_s21  ;;  %p1622_p0 = scmp.lt.u32.totalorder %s2028_s16, %s2081_s8 }
 0x3d3   : > { %p1623_p1 = scmp.lt.u32.totalorder %s1621_s23, %s1617_s21  ;;  %p1625_p3 = scmp.lt.u32.totalorder %s1617_s21, %s2028_s16 }
 0x3d4   : > { %p1619_p12 = pnand %p1618_p11, %p1763_p5 }
 0x3d5   : > { %p1624_p2 = por %p1623_p1, %p1622_p0 }
 0x3d6   : > { %p1620_p13 = pneg %p1619_p12 }
 0x3d7   : > { %p1626_p4 = por %p1625_p3, %p1624_p2 }
 0x3d9   : > { %p1627_p7 = pnand %p1626_p4, %p1620_p13 }
 0x3db   : > { %1630 = shalt.err (!%p1627_p7)
}
 0x3dc   : > { %1423 = dma.vmem_to_hbm [thread:$0]  (%p1763_p5), %s2030_s13, 64, %s2028_s16, %s1253_s29  }
 0x3dd PF: > { %p1434_p8 = scmp.ge.s32.totalorder %s1669_s12, 2  ;;  %s1298_s17 = sand.u32 1, %s1657_s30  }
 0x3de   : > { %s1299_s22 = scalar_lea.sflag [#allocation3], %s1298_s17 }
 0x3df   : > { %p1428_p9 = pnand %p1434_p8, %p1767_p6 }
 0x3e1   : > { %1648 = dma.done.wait (!%p1428_p9), %s1299_s22, 64  }
 0x3e2   : > { %1650 = vsyncadd (!%p1428_p9), %s1299_s22, 4294967232  ;;  %s1308_s24 = scalar_lea.sflag [#allocation5], %s1298_s17 }
 0x3e3   : > { %1652 = dma.done.wait (!%p1428_p9), %s1308_s24, 64  }
 0x3e4   : > { %1654 = vsyncadd (!%p1428_p9), %s1308_s24, 4294967232  ;;  %p23_p5 = scmp.ge.s32.totalorder %s1750_s15, 4   ;;  %s2089_s30 = smov %s1661_s10 }
 0x3e5   : > { %s2090_s10 = smov %s1665_s11  ;;  %s2091_s11 = smov %s1761_s18 }
 0x3e6   : > { %s2092_s12 = smov %s1750_s15  ;;  %25 = sbr.rel (!%p23_p5) target bundleno = 5 (0x5), region = 107 }
 0x3ed   :  { %1313 = vsyncpa [#allocation3], 1 }
 0x3ee   :  { %1315 = vsyncpa [#allocation3 + $0x1], 1 }
 0x3ef   :  { %1316 = vsyncpa [#allocation5], 1 }
 0x3f0   :  { %1318 = vsyncpa [#allocation5 + $0x1], 1 }

</bundles_post_ra>
